<compile_context>
chip_gen: v7x
topology: tpu7x:2x2x1
jax: 0.10.0
libtpu: 0.0.40
codegen_flags: <defaults>
</compile_context>

<pallas_src>
import functools

import jax
import jax.numpy as jnp
from jax import lax
from jax.experimental import pallas as pl
from jax.experimental.pallas import tpu as pltpu


# ----------------------------- tiling helpers --------------------------------

def _row_tile(m, target=512):
    """Largest row tile (mult. of 8) <= target that divides m; also keeps the
    row-tile count >= 2 when possible (2 TensorCores on v7x)."""
    target = min(target, max(8, m // 2))
    if m <= target:
        return m
    for t in (512, 256, 128, 64, 32, 16, 8):
        if t <= target and m % t == 0:
            return t
    return m


def _col_tile(n, target=1024):
    """Vocab-axis tile for the lm_head (bounds the resident weight slab; the
    smaller default also suits v5e's tighter VMEM)."""
    if n <= target or n % 128 != 0:
        return n
    for t in (1024, 512, 256, 128):
        if n % t == 0:
            return t
    return n


def _pick_chunk(t, target=64):
    """GLA outer chunk (module spec: chunk_size=64)."""
    for c in (target, 32, 16, 8):
        if t % c == 0:
            return c
    return t


def _cp(semantics, tile_bytes):
    """CompilerParams with an explicit scoped-VMEM limit derived from the
    actual tile bytes (x2 for double buffering + margin), clamped to the v7x
    64 MiB physical budget."""
    vmem = int(min(max(2 * tile_bytes + (2 << 20), 4 << 20), 64 << 20))
    return pltpu.CompilerParams(dimension_semantics=semantics,
                                vmem_limit_bytes=vmem)


# ----------------------------- Pallas kernels --------------------------------

def _proj_kernel(x_ref, wqkvg_ref, wgk1_ref, wgk2_ref, bgk2_ref, o_ref, *, gln):
    """Fused q/k/v/g + low-rank-gate projection.

    Output columns: [ q | k | v | g | gk ].  The qkvg matmul runs with bf16
    operands / f32 accumulation; qkvg and gk are written with two aligned
    static-slice stores (no in-kernel concatenate)."""
    x = x_ref[...]                                                  # (bm, D) f32
    n_qkvg = wqkvg_ref.shape[1]
    qkvg = jnp.dot(x.astype(jnp.bfloat16), wqkvg_ref[...],
                   preferred_element_type=jnp.float32)              # (bm, n_qkvg)
    o_ref[:, :n_qkvg] = qkvg.astype(o_ref.dtype)
    # small low-rank gate path kept in f32 (gate precision matters).
    z1 = jnp.dot(x, wgk1_ref[...], preferred_element_type=jnp.float32)
    gk = (jnp.dot(z1, wgk2_ref[...], preferred_element_type=jnp.float32)
          + bgk2_ref[...])
    # stable log-sigmoid / gate_logit_normalizer
    gk = (jnp.minimum(gk, 0.0) - jnp.log(1.0 + jnp.exp(-jnp.abs(gk)))) / gln
    o_ref[:, n_qkvg:] = gk.astype(o_ref.dtype)


def fused_projection(x2d, wqkvg, wgk1, wgk2, bgk2, *, gln):
    M, D = x2d.shape
    n_qkvg = wqkvg.shape[1]
    glr = wgk1.shape[1]
    key_dim = wgk2.shape[1]
    P_out = n_qkvg + key_dim
    bm = _row_tile(M)
    # TODO(synk): column-tile Wqkvg (second grid axis) for very large d_model
    # on v7x; bf16 weights + explicit vmem_limit cover the configured sizes.
    tile_bytes = (bm * D * 4 + D * n_qkvg * 2 + D * glr * 4
                  + glr * key_dim * 4 + key_dim * 4 + bm * P_out * 4)
    return pl.pallas_call(
        functools.partial(_proj_kernel, gln=gln),
        out_shape=jax.ShapeDtypeStruct((M, P_out), jnp.float32),
        grid=(pl.cdiv(M, bm),),
        in_specs=[pl.BlockSpec((bm, D), lambda i: (i, 0)),
                  pl.BlockSpec((D, n_qkvg), lambda i: (0, 0)),
                  pl.BlockSpec((D, glr), lambda i: (0, 0)),
                  pl.BlockSpec((glr, key_dim), lambda i: (0, 0)),
                  pl.BlockSpec((1, key_dim), lambda i: (0, 0))],
        out_specs=pl.BlockSpec((bm, P_out), lambda i: (i, 0)),
        compiler_params=_cp(("parallel",), tile_bytes),
    )(x2d, wqkvg.astype(jnp.bfloat16), wgk1, wgk2, bgk2.reshape(1, key_dim))


def _gla_chunk_kernel(p_ref, gw_ref, wo_ref, o_ref, s_ref, oacc_ref, *,
                      H, dk, dv, scale, sub, eps):
    """Chunked gated linear attention, all heads per step, fused norm+gate+Wo.

    p_ref block  : (C, P) columns [ q | k | v | g | gk ] (head-major).
    o_ref block  : (C, d_model)  = (gated, normalized o) @ Wo  (lane-dense).
    s_ref scratch: (dv, H*dk)    per-head state, transposed & head-merged.
    oacc scratch : (C, H*dv)     gated per-head outputs before the Wo matmul.
    The cross-chunk q@S term and the state update run once per chunk; the
    intra-chunk attention runs per subchunk (bounded exponents)."""
    c = pl.program_id(1)

    @pl.when(c == 0)
    def _():
        s_ref[...] = jnp.zeros_like(s_ref)

    blk = p_ref[...].astype(jnp.float32)               # (C, P)
    C = blk.shape[0]
    K, V = H * dk, H * dv
    q_all = blk[:, :K]
    k_all = blk[:, K:2 * K]
    v_all = blk[:, 2 * K:2 * K + V]
    g_all = blk[:, 2 * K + V:2 * K + 2 * V]
    gk_all = blk[:, 2 * K + 2 * V:]                     # logsigmoid/gln, <= 0
    gw = gw_ref[...]                                    # (1, dv)

    nsub = C // sub

    # Chunk-wide inclusive gate cumsum for ALL heads in one MXU matmul.
    rowC = lax.broadcasted_iota(jnp.int32, (C, C), 0)
    colC = lax.broadcasted_iota(jnp.int32, (C, C), 1)
    causal_C = (colC <= rowC).astype(jnp.float32)
    B = jnp.dot(causal_C, gk_all, preferred_element_type=jnp.float32)   # (C, K)
    B_last = B[C - 1:C, :]                              # (1, K)

    # Lane-dense (all heads) gate scalings; every exponent is <= 0 except the
    # subchunk-local exp(-b_loc), which is bounded by the subchunk length.
    qB_all = q_all * (jnp.exp(B) * scale)               # inter-chunk q
    k_dec_all = k_all * jnp.exp(B_last - B)             # cross-chunk state update
    decay_last = jnp.exp(B_last)                        # per-dk state decay

    rows = lax.broadcasted_iota(jnp.int32, (sub, sub), 0)
    cols = lax.broadcasted_iota(jnp.int32, (sub, sub), 1)
    causal_s = (cols <= rows).astype(jnp.float32)       # lower-tri incl. diag

    q_dec, k_inv, trans = [], [], []
    for i in range(nsub):
        lo = i * sub
        a_i = B[lo - 1:lo, :] if i > 0 else jnp.zeros_like(B_last)
        b_loc = B[lo:lo + sub, :] - a_i                 # <= 0
        e = jnp.exp(b_loc)
        q_dec.append(q_all[lo:lo + sub, :] * (e * scale))
        k_inv.append(k_all[lo:lo + sub, :] * jnp.exp(-b_loc))
        if i + 1 < nsub:
            trans.append(jnp.exp(B[lo + sub - 1:lo + sub, :] - a_i))   # <= 1

    for h in range(H):                                  # static unroll, small H
        ks = slice(h * dk, (h + 1) * dk)
        vs = slice(h * dv, (h + 1) * dv)
        stT = s_ref[:, ks]                              # (dv, dk) state BEFORE chunk
        # inter-chunk contribution, whole chunk at once
        o_inter = lax.dot_general(qB_all[:, ks], stT, (((1,), (1,)), ((), ())),
                                  preferred_element_type=jnp.float32)  # (C, dv)
        v_h = v_all[:, vs]
        g_h = g_all[:, vs]

        s_locT = jnp.zeros((dv, dk), jnp.float32)       # within-chunk local state
        for i in range(nsub):
            lo = i * sub
            qd = q_dec[i][:, ks]
            ki = k_inv[i][:, ks]
            vi = v_h[lo:lo + sub, :]
            att = lax.dot_general(qd, ki, (((1,), (1,)), ((), ())),
                                  preferred_element_type=jnp.float32) * causal_s
            o_sub = jnp.dot(att, vi, preferred_element_type=jnp.float32)
            if i > 0:                                   # earlier subchunks in chunk
                o_sub = o_sub + lax.dot_general(
                    qd, s_locT, (((1,), (1,)), ((), ())),
                    preferred_element_type=jnp.float32)
            o_sub = o_sub + o_inter[lo:lo + sub, :]

            # FusedRMSNormSwishGate epilogue (per-row RMSNorm over dv + swish gate)
            ms = jnp.mean(o_sub * o_sub, axis=-1, keepdims=True)
            o_n = o_sub * lax.rsqrt(ms + eps) * gw
            gi = g_h[lo:lo + sub, :]
            oacc_ref[lo:lo + sub, vs] = o_n * (gi * (1.0 / (1.0 + jnp.exp(-gi))))

            if i + 1 < nsub:                            # advance local state
                tr = trans[i][:, ks]
                kl = ki * tr
                vk = lax.dot_general(vi, kl, (((0,), (0,)), ((), ())),
                                     preferred_element_type=jnp.float32)
                s_locT = s_locT * tr + vk

        # cross-chunk state update: once per chunk per head
        vk_full = lax.dot_general(v_h, k_dec_all[:, ks], (((0,), (0,)), ((), ())),
                                  preferred_element_type=jnp.float32)  # (dv, dk)
        s_ref[:, ks] = stT * decay_last[:, ks] + vk_full

    # Fused Wo output projection: one lane-dense store of the layer output.
    o_ref[...] = jnp.dot(oacc_ref[...].astype(jnp.bfloat16), wo_ref[...],
                         preferred_element_type=jnp.float32).astype(o_ref.dtype)


def gla_fused_attention(proj3, gnorm_w, wo, *, n_heads, dk, dv, scale,
                        chunk, sub, eps):
    """proj3: (B, T, P) fused projections -> (B, T, d_model) layer output."""
    Bb, T, P = proj3.shape
    value_dim = n_heads * dv
    d_model = wo.shape[1]
    assert P == 3 * n_heads * dk + 2 * value_dim
    assert T % chunk == 0 and chunk % sub == 0
    nc = T // chunk
    # TODO(synk): if Bb == 1 (decode), add a head/row parallel axis so both
    # v7x TensorCores get work; Bb >= 2 here.
    kern = functools.partial(_gla_chunk_kernel, H=n_heads, dk=dk, dv=dv,
                             scale=scale, sub=sub, eps=eps)
    tile_bytes = (chunk * P * 4 + dv * 4 + value_dim * d_model * 2
                  + chunk * d_model * 4 + dv * n_heads * dk * 4
                  + chunk * value_dim * 4)
    return pl.pallas_call(
        kern,
        out_shape=jax.ShapeDtypeStruct((Bb, T, d_model), jnp.float32),
        grid=(Bb, nc),
        in_specs=[pl.BlockSpec((None, chunk, P), lambda b, c: (b, c, 0)),
                  pl.BlockSpec((1, dv), lambda b, c: (0, 0)),
                  pl.BlockSpec((value_dim, d_model), lambda b, c: (0, 0))],
        out_specs=pl.BlockSpec((None, chunk, d_model), lambda b, c: (b, c, 0)),
        scratch_shapes=[pltpu.VMEM((dv, n_heads * dk), jnp.float32),
                        pltpu.VMEM((chunk, value_dim), jnp.float32)],
        compiler_params=_cp(("parallel", "arbitrary"), tile_bytes),
    )(proj3, gnorm_w.reshape(1, dv), wo.astype(jnp.bfloat16))


def _ln_lmhead_kernel(x_ref, lnw_ref, lnb_ref, w_ref, b_ref, o_ref, *, eps):
    """Final LayerNorm fused into the lm_head prologue (bf16 MXU operands)."""
    x = x_ref[...]
    mu = jnp.mean(x, axis=-1, keepdims=True)
    xc = x - mu
    var = jnp.mean(xc * xc, axis=-1, keepdims=True)
    xn = xc * lax.rsqrt(var + eps) * lnw_ref[...] + lnb_ref[...]
    o_ref[...] = (jnp.dot(xn.astype(jnp.bfloat16), w_ref[...],
                          preferred_element_type=jnp.float32)
                  + b_ref[...]).astype(o_ref.dtype)


def ln_lm_head(x2d, ln_w, ln_b, w, b, *, eps=1e-5):
    M, D = x2d.shape
    N = w.shape[1]
    bm = _row_tile(M)
    bn = _col_tile(N)
    tile_bytes = bm * D * 4 + 2 * D * 4 + D * bn * 2 + bn * 4 + bm * bn * 4
    # Weight-stationary ordering: vocab tiles on the OUTER grid axis, row tiles
    # inner, so each (D, bn) weight slab is DMA'd from HBM once.
    # TODO(synk): LayerNorm is recomputed per vocab tile (cheap VPU work traded
    # for not re-streaming the vocab weight).
    return pl.pallas_call(
        functools.partial(_ln_lmhead_kernel, eps=eps),
        out_shape=jax.ShapeDtypeStruct((M, N), jnp.float32),
        grid=(pl.cdiv(N, bn), pl.cdiv(M, bm)),
        in_specs=[pl.BlockSpec((bm, D), lambda j, i: (i, 0)),
                  pl.BlockSpec((1, D), lambda j, i: (0, 0)),
                  pl.BlockSpec((1, D), lambda j, i: (0, 0)),
                  pl.BlockSpec((D, bn), lambda j, i: (0, j)),
                  pl.BlockSpec((1, bn), lambda j, i: (0, j))],
        out_specs=pl.BlockSpec((bm, bn), lambda j, i: (i, j)),
        compiler_params=_cp(("parallel", "parallel"), tile_bytes),
    )(x2d, ln_w.reshape(1, D), ln_b.reshape(1, D),
      w.astype(jnp.bfloat16), b.reshape(1, N))


# ------------------------------ model (glue) ---------------------------------

def init_params(key, *, vocab_size, d_model, n_heads, num_layers,
                expand_k=0.5, expand_v=1.0, gate_low_rank_dim=16):
    key_dim = int(d_model * expand_k)
    value_dim = int(d_model * expand_v)
    dk = key_dim // n_heads
    dv = value_dim // n_heads

    def dense(k, fan_in, fan_out):
        return (jax.random.normal(k, (fan_in, fan_out), jnp.float32)
                / jnp.sqrt(jnp.float32(fan_in)))

    keys = jax.random.split(key, 4 + num_layers)
    params = {
        'embedding': jax.random.normal(keys[0], (vocab_size, d_model), jnp.float32) * 0.02,
        'ln_w': jnp.ones((d_model,), jnp.float32),
        'ln_b': jnp.zeros((d_model,), jnp.float32),
        'lm_w': dense(keys[1], d_model, vocab_size),
        'lm_b': jnp.zeros((vocab_size,), jnp.float32),
        'layers': [],
    }
    for li in range(num_layers):
        lk = jax.random.split(keys[4 + li], 8)
        layer = {
            'Wq': dense(lk[0], d_model, key_dim),
            'Wk': dense(lk[1], d_model, key_dim),
            'Wv': dense(lk[2], d_model, value_dim),
            'Wg': dense(lk[3], d_model, value_dim),
            'Wgk1': dense(lk[4], d_model, gate_low_rank_dim),
            'Wgk2': dense(lk[5], gate_low_rank_dim, key_dim),
            'bgk2': jax.random.normal(lk[6], (key_dim,), jnp.float32) * 0.5,
            'Wo': dense(lk[7], value_dim, d_model),
            'gnorm_w': jnp.ones((dv,), jnp.float32),
        }
        layer['Wqkvg'] = jnp.concatenate(
            [layer['Wq'], layer['Wk'], layer['Wv'], layer['Wg']], axis=1)
        params['layers'].append(layer)
    meta = dict(n_heads=n_heads, dk=dk, dv=dv, gate_logit_normalizer=16.0)
    return params, meta


def gla_layer_forward(x, p, meta, *, chunk, sub):
    B, T, D = x.shape
    H, dk, dv = meta['n_heads'], meta['dk'], meta['dv']
    x2 = x.reshape(B * T, D)
    proj = fused_projection(x2, p['Wqkvg'], p['Wgk1'], p['Wgk2'], p['bgk2'],
                            gln=meta['gate_logit_normalizer'])
    # TODO(synk): store proj / layer activations in bf16 for production HBM
    # traffic; kept f32 here to hold the strict f32 reference tolerance.
    return gla_fused_attention(proj.reshape(B, T, -1), p['gnorm_w'], p['Wo'],
                               n_heads=H, dk=dk, dv=dv, scale=dk ** -0.5,
                               chunk=chunk, sub=sub, eps=1e-5)


def gla_transformer_forward(input_ids, params, meta, attention_mask=None):
    # TODO(synk): attention_mask-driven unpad/repad (fla varlen path) not
    # implemented; semantics here match attention_mask=None.
    B, T = input_ids.shape
    chunk = _pick_chunk(T, target=64)            # module spec: chunk_size=64
    sub = 16 if chunk % 16 == 0 else chunk       # module spec: subchunk_size=16
    x = params['embedding'][input_ids]           # embedding gather (plain-JAX glue)
    for p in params['layers']:
        x = gla_layer_forward(x, p, meta, chunk=chunk, sub=sub)
    D = x.shape[-1]
    logits = ln_lm_head(x.reshape(B * T, D), params['ln_w'], params['ln_b'],
                        params['lm_w'], params['lm_b'], eps=1e-5)
    return logits.reshape(B, T, -1)


# ---------------------------- pure-JAX reference -----------------------------

def _ref_gla(q, k, v, gk, scale):
    def per_head(qh, kh, vh, gh):
        S0 = jnp.zeros((qh.shape[-1], vh.shape[-1]), jnp.float32)

        def step(S, inp):
            qt, kt, vt, gt = inp
            S = S * jnp.exp(gt)[:, None] + kt[:, None] * vt[None, :]
            return S, (qt * scale) @ S

        _, o = lax.scan(step, S0, (qh, kh, vh, gh))
        return o

    return jax.vmap(jax.vmap(per_head))(q, k, v, gk)


def reference_forward(input_ids, params, meta):
    B, T = input_ids.shape
    H, dk, dv = meta['n_heads'], meta['dk'], meta['dv']
    x = params['embedding'][input_ids]
    for p in params['layers']:
        q, k, v, g = x @ p['Wq'], x @ p['Wk'], x @ p['Wv'], x @ p['Wg']
        gk = (x @ p['Wgk1']) @ p['Wgk2'] + p['bgk2']
        gk = jax.nn.log_sigmoid(gk) / meta['gate_logit_normalizer']

        def heads(t, d):
            return t.reshape(B, T, H, d).transpose(0, 2, 1, 3)

        o = _ref_gla(heads(q, dk), heads(k, dk), heads(v, dv), heads(gk, dk),
                     dk ** -0.5)
        o = o.transpose(0, 2, 1, 3)                         # (B, T, H, dv)
        o = o * lax.rsqrt(jnp.mean(o * o, axis=-1, keepdims=True) + 1e-5)
        o = o * p['gnorm_w']
        gg = g.reshape(B, T, H, dv)
        o = o * gg * jax.nn.sigmoid(gg)
        x = o.reshape(B, T, H * dv) @ p['Wo']
    mu = jnp.mean(x, -1, keepdims=True)
    var = jnp.mean((x - mu) ** 2, -1, keepdims=True)
    x = (x - mu) * lax.rsqrt(var + 1e-5) * params['ln_w'] + params['ln_b']
    return x @ params['lm_w'] + params['lm_b']


# ---------------------------------- main -------------------------------------

if __name__ == "__main__":
    # GLATransformer(d_model=32, n_heads=2, num_layers=2, vocab_size=64)
    VOCAB, D_MODEL, N_HEADS, N_LAYERS = 64, 32, 2, 2
    B, T = 2, 128    # T=128 exercises multi-chunk state carry and subchunking

    key = jax.random.PRNGKey(0)
    pkey, ikey = jax.random.split(key)
    params, meta = init_params(pkey, vocab_size=VOCAB, d_model=D_MODEL,
                               n_heads=N_HEADS, num_layers=N_LAYERS)
    input_ids = jax.random.randint(ikey, (B, T), 0, VOCAB, dtype=jnp.int32)

    logits = gla_transformer_forward(input_ids, params, meta)
    logits = jax.block_until_ready(logits)

    ref = reference_forward(input_ids, params, meta)
    assert logits.shape == (B, T, VOCAB)
    assert bool(jnp.all(jnp.isfinite(logits)))
    err = float(jnp.max(jnp.abs(logits - ref)))
    # bf16 MXU operands (per perf review) vs. a pure-f32 reference.
    assert bool(jnp.allclose(logits, ref, rtol=5e-2, atol=5e-2)), (
        "max abs err = %g" % err)
    print("KERNEL_OK")
</pallas_src>

<mosaic_0001>
module attributes {stable_mosaic.version = 11 : i64} {
  func.func @_proj_kernel(%arg0: i32, %arg1: memref<128x32xf32, #tpu.memory_space<vmem>>, %arg2: memref<32x96xbf16, #tpu.memory_space<vmem>>, %arg3: memref<32x16xf32, #tpu.memory_space<vmem>>, %arg4: memref<16x16xf32, #tpu.memory_space<vmem>>, %arg5: memref<1x16xf32, #tpu.memory_space<vmem>>, %arg6: memref<128x112xf32, #tpu.memory_space<vmem>>) attributes {dimension_semantics = [#tpu.dimension_semantics<parallel>], iteration_bounds = array<i64: 2>, scalar_prefetch = 0 : i64, scratch_operands = 0 : i64, tpu.core_type = #tpu.core_type<tc>, window_params = [{transform_indices = @transform_0, window_bounds = array<i64: 128, 32>}, {pipeline_mode = #tpu.pipeline_mode<synchronous>, transform_indices = @transform_1, window_bounds = array<i64: 32, 96>}, {pipeline_mode = #tpu.pipeline_mode<synchronous>, transform_indices = @transform_2, window_bounds = array<i64: 32, 16>}, {pipeline_mode = #tpu.pipeline_mode<synchronous>, transform_indices = @transform_3, window_bounds = array<i64: 16, 16>}, {pipeline_mode = #tpu.pipeline_mode<synchronous>, transform_indices = @transform_4, window_bounds = array<i64: 1, 16>}, {transform_indices = @transform_5, window_bounds = array<i64: 128, 112>}]} {
    %c0 = arith.constant 0 : index
    %c0_0 = arith.constant 0 : index
    %0 = vector.load %arg1[%c0, %c0_0] : memref<128x32xf32, #tpu.memory_space<vmem>>, vector<128x32xf32>
    %1 = arith.truncf %0 : vector<128x32xf32> to vector<128x32xbf16>
    %c0_1 = arith.constant 0 : index
    %c0_2 = arith.constant 0 : index
    %2 = vector.load %arg2[%c0_1, %c0_2] : memref<32x96xbf16, #tpu.memory_space<vmem>>, vector<32x96xbf16>
    %cst = arith.constant dense<0.000000e+00> : vector<128x96xf32>
    %3 = tpu.matmul %1, %2, %cst {dimension_numbers = #tpu.dot_dimension_numbers<[1], [0], [0], [1], [0, 0, 1, 1], [], []>} : vector<128x32xbf16>, vector<32x96xbf16>, vector<128x96xf32> -> vector<128x96xf32>
    %c0_3 = arith.constant 0 : index
    %c0_4 = arith.constant 0 : index
    %4 = vector.load %arg6[%c0_3, %c0_4] : memref<128x112xf32, #tpu.memory_space<vmem>>, vector<128x96xf32>
    tpu.vector_store %arg6[%c0_3, %c0_4], %3 {strides = array<i32>} : memref<128x112xf32, #tpu.memory_space<vmem>>, vector<128x96xf32>,
    %c0_5 = arith.constant 0 : index
    %c0_6 = arith.constant 0 : index
    %5 = vector.load %arg3[%c0_5, %c0_6] : memref<32x16xf32, #tpu.memory_space<vmem>>, vector<32x16xf32>
    %cst_7 = arith.constant dense<0.000000e+00> : vector<128x16xf32>
    %6 = tpu.matmul %0, %5, %cst_7 {dimension_numbers = #tpu.dot_dimension_numbers<[1], [0], [0], [1], [0, 0, 1, 1], [], []>} : vector<128x32xf32>, vector<32x16xf32>, vector<128x16xf32> -> vector<128x16xf32>
    %c0_8 = arith.constant 0 : index
    %c0_9 = arith.constant 0 : index
    %7 = vector.load %arg4[%c0_8, %c0_9] : memref<16x16xf32, #tpu.memory_space<vmem>>, vector<16x16xf32>
    %cst_10 = arith.constant dense<0.000000e+00> : vector<128x16xf32>
    %8 = tpu.matmul %6, %7, %cst_10 {dimension_numbers = #tpu.dot_dimension_numbers<[1], [0], [0], [1], [0, 0, 1, 1], [], []>} : vector<128x16xf32>, vector<16x16xf32>, vector<128x16xf32> -> vector<128x16xf32>
    %c0_11 = arith.constant 0 : index
    %c0_12 = arith.constant 0 : index
    %9 = vector.load %arg5[%c0_11, %c0_12] : memref<1x16xf32, #tpu.memory_space<vmem>>, vector<1x16xf32>
    %10 = vector.broadcast %9 : vector<1x16xf32> to vector<128x16xf32>
    %11 = arith.addf %8, %10 : vector<128x16xf32>
    %cst_13 = arith.constant 0.000000e+00 : f32
    %12 = vector.broadcast %cst_13 : f32 to vector<128x16xf32>
    %13 = arith.minimumf %11, %12 : vector<128x16xf32>
    %14 = math.absf %11 : vector<128x16xf32>
    %cst_14 = arith.constant 0.000000e+00 : f32
    %15 = vector.broadcast %cst_14 : f32 to vector<128x16xf32>
    %16 = arith.subf %15, %14 : vector<128x16xf32>
    %17 = math.exp %16 : vector<128x16xf32>
    %cst_15 = arith.constant 1.000000e+00 : f32
    %18 = vector.broadcast %cst_15 : f32 to vector<128x16xf32>
    %19 = arith.addf %18, %17 : vector<128x16xf32>
    %20 = math.log %19 : vector<128x16xf32>
    %21 = arith.subf %13, %20 : vector<128x16xf32>
    %cst_16 = arith.constant 1.600000e+01 : f32
    %22 = vector.broadcast %cst_16 : f32 to vector<128x16xf32>
    %23 = arith.divf %21, %22 : vector<128x16xf32>
    %c0_17 = arith.constant 0 : index
    %c96 = arith.constant 96 : index
    %24 = vector.load %arg6[%c0_17, %c96] : memref<128x112xf32, #tpu.memory_space<vmem>>, vector<128x16xf32>
    tpu.vector_store %arg6[%c0_17, %c96], %23 {strides = array<i32>} : memref<128x112xf32, #tpu.memory_space<vmem>>, vector<128x16xf32>,
    return
  }
  func.func @transform_0(%arg0: i32) -> (i32, i32) {
    %c0_i32 = arith.constant 0 : i32
    %c0_i32_0 = arith.constant 0 : i32
    return %arg0, %c0_i32 : i32, i32
  }
  func.func @transform_1(%arg0: i32) -> (i32, i32) {
    %c0_i32 = arith.constant 0 : i32
    %c0_i32_0 = arith.constant 0 : i32
    %c0_i32_1 = arith.constant 0 : i32
    return %c0_i32, %c0_i32_0 : i32, i32
  }
  func.func @transform_2(%arg0: i32) -> (i32, i32) {
    %c0_i32 = arith.constant 0 : i32
    %c0_i32_0 = arith.constant 0 : i32
    %c0_i32_1 = arith.constant 0 : i32
    return %c0_i32, %c0_i32_0 : i32, i32
  }
  func.func @transform_3(%arg0: i32) -> (i32, i32) {
    %c0_i32 = arith.constant 0 : i32
    %c0_i32_0 = arith.constant 0 : i32
    %c0_i32_1 = arith.constant 0 : i32
    return %c0_i32, %c0_i32_0 : i32, i32
  }
  func.func @transform_4(%arg0: i32) -> (i32, i32) {
    %c0_i32 = arith.constant 0 : i32
    %c0_i32_0 = arith.constant 0 : i32
    %c0_i32_1 = arith.constant 0 : i32
    return %c0_i32, %c0_i32_0 : i32, i32
  }
  func.func @transform_5(%arg0: i32) -> (i32, i32) {
    %c0_i32 = arith.constant 0 : i32
    %c0_i32_0 = arith.constant 0 : i32
    return %arg0, %c0_i32 : i32, i32
  }
}

</mosaic_0001>

<bundles_post_ra>
// kernel: tpu_custom_call.1
= control target key start
LH: loop header
LB: loop body
LE: loop exit
PB: predicated region body
PF: predicated region fallthrough
CT: control target
= control target key end

     0   :  { %s1418_s18 = smov 0   ;;  %s1691_s0 = inlined_call_operand.vmem [shape: f32[256,32], index: 0, kind: input, shape index: {}]   ;;  %s1692_s1 = inlined_call_operand.vmem [shape: bf16[32,96], index: 1, kind: input, shape index: {}]   ;;  %s1693_s2 = inlined_call_operand.vmem [shape: f32[32,16], index: 2, kind: input, shape index: {}]   ;;  %s1694_s3 = inlined_call_operand.vmem [shape: f32[16,16], index: 3, kind: input, shape index: {}]   ;;  %s1695_s4 = inlined_call_operand.vmem [shape: f32[1,16], index: 4, kind: input, shape index: {}]   ;;  %s1696_s5 = inlined_call_operand.vmem [shape: f32[256,112], index: 5, kind: output, shape index: {}]  }
   0x1 LB: > { %s1106_s19 = sadd.s32 4294967295, %s1385_s18   ;;  %p1110_p0 = scmp.ge.s32.totalorder %s1385_s18, 1  ;;  %s1385_s18 = sphi %s1418_s18, %s15_s18  }
   0x2   : > { %p188_p1 = scmp.lt.s32.totalorder %s1385_s18, 3 }
   0x4   : > { %p189_p2 = pnand %p1110_p0, %p188_p1 }
   0x5   : > { %v1313_v0 = vld [vmem:[%s1692_s1] sm:$0xff] (!%p189_p2)   ;;  %s1111_s22 = sshll.u32 (!%p189_p2), %s1106_s19, 4  ;;  %v1314_v1 = vld [vmem:[%s1692_s1 + $0x8] sm:$0xff] (!%p189_p2)   ;;  %v410_v5 = vld [vmem:[%s1693_s2 + $0x10] sm:$0xff] (!%p189_p2)  ;;  %vm269_vm0 = vcmask (!%p189_p2), 261120   ;;  %vm391_vm1 = vcmask (!%p189_p2), 785408  }
   0x6   : > { %192 = sbr.rel (%p189_p2) target bundleno = 658 (0x292), region = 40  ;;  %p217_p3 = scmp.lt.s32.totalorder (!%p189_p2), %s1111_s22, 31  ;;  %1300 = vmatprep.subr.bf16.mxu1 (!%p189_p2), %v1313_v0  ;;  %v408_v2 = vld [vmem:[%s1693_s2] sm:$0xff] (!%p189_p2)  ;;  %v409_v3 = vld [vmem:[%s1693_s2 + $0x8] sm:$0xff] (!%p189_p2)  ;;  %1208 = vmatprep.subr.bf16.mxu0 (!%p189_p2), %v1313_v0  ;;  %v411_v6 = vld [vmem:[%s1693_s2 + $0x18] sm:$0xff] (!%p189_p2)  ;;  %vm614_vm2 = vcmask (!%p189_p2), 130048  }
   0x7   : > { %1302 = vmatpush3.bf16.msra.mxu1 (!%p189_p2), %v1313_v0  ;;  %1209 = vmatpush3.bf16.msra.mxu0 (!%p189_p2), %v1313_v0  ;;  %v1288_v4 = vpack.c.bf16 (!%p189_p2), %v409_v3, %v408_v2  ;;  %v1292_v16 = vpack.c.bf16 (!%p189_p2), %v411_v6, %v410_v5  ;;  %v605_v32 = vld [vmem:[%s1694_s3] sm:$0xff] (!%p189_p2)  ;;  %v606_v33 = vld [vmem:[%s1694_s3 + $0x8] sm:$0xff] (!%p189_p2)  ;;  %vm1033_vm3 = vcmask (!%p189_p2), 917248  }
   0x8   : > { %1301 = vmatprep.subr.bf16.mxu1 (!%p189_p2), %v1314_v1  ;;  %1210 = vmatprep.subr.bf16.mxu0 (!%p189_p2), %v1314_v1  ;;  %v1296_v34 = vpack.c.bf16 (!%p189_p2), %v606_v33, %v605_v32  ;;  %v1558_v3 = vld [vmem:[%s1695_s4] ss:$0 sm:$0xff] (!%p189_p2) }
   0xb   : > { %1303 = vmatpush3.bf16.msra.mxu1 (!%p189_p2), %v1314_v1  ;;  %1211 = vmatpush3.bf16.msra.mxu0 (!%p189_p2), %v1314_v1 }
   0xc   : > { %1289 = vmatprep.subr.bf16.mxu1 (!%p189_p2), %v1288_v4  ;;  %1297 = vmatprep.subr.bf16.mxu0 (!%p189_p2), %v1296_v34 }
   0xd   : > { %s1698_s22 = smov (!%p217_p3, %s1111_s22), 31 }
   0xe   : > { %s1112_s29 = sshll.u32 %s1698_s22, 3  ;;  %s1387_s22 = smov 96  }
   0xf   : > { %s1446_s7 = scalar_lea.vmem %s1691_s0, %s1112_s29  ;;  %s1505_s19 = scalar_lea.vmem %s1696_s5, %s1112_s29 }
  0x10   : > { %v237_v7 = vld [vmem:[%s1446_s7 + $0x40] sm:$0xff]  ;;  %v238_v8 = vld [vmem:[%s1446_s7 + $0x48] sm:$0xff]  ;;  %v239_v9 = vld [vmem:[%s1446_s7 + $0x50] sm:$0xff] }
  0x11   : > { %v249_v10 = vpack.c.bf16 %v238_v8, %v237_v7  ;;  %v240_v11 = vld [vmem:[%s1446_s7 + $0x58] sm:$0xff]  ;;  %v241_v12 = vld [vmem:[%s1446_s7 + $0x60] sm:$0xff]  ;;  %v242_v13 = vld [vmem:[%s1446_s7 + $0x68] sm:$0xff] }
  0x12   : > { %v250_v14 = vpack.c.bf16 %v240_v11, %v239_v9  ;;  %v251_v15 = vpack.c.bf16 %v242_v13, %v241_v12  ;;  %v229_v17 = vld [vmem:[%s1446_s7] sm:$0xff]  ;;  %v230_v18 = vld [vmem:[%s1446_s7 + $0x8] sm:$0xff]  ;;  %v231_v19 = vld [vmem:[%s1446_s7 + $0x10] sm:$0xff] }
  0x13   : > { %1220 = vmatprep.mubr.msk.bf16.mxu1 %vm269_vm0, %v249_v10  ;;  %v232_v20 = vld [vmem:[%s1446_s7 + $0x18] sm:$0xff]  ;;  %v233_v22 = vld [vmem:[%s1446_s7 + $0x20] sm:$0xff]  ;;  %v234_v23 = vld [vmem:[%s1446_s7 + $0x28] sm:$0xff]  ;;  %v245_v24 = vpack.c.bf16 %v230_v18, %v229_v17 }
  0x14   : > { %1221 = vmatmul.mubr.msk.bf16.vlgmr.msra.gmra.mrb[0].mxu1 %vm269_vm0, %v250_v14  ;;  %v246_v21 = vpack.c.bf16 %v232_v20, %v231_v19  ;;  %v243_v25 = vld [vmem:[%s1446_s7 + $0x70] sm:$0xff]  ;;  %v244_v26 = vld [vmem:[%s1446_s7 + $0x78] sm:$0xff]  ;;  %v247_v27 = vpack.c.bf16 %v234_v23, %v233_v22 }
  0x15   : > { %1291 = vmatpush3.bf16.msra.mxu1 %v1288_v4  ;;  %1224 = vmatprep.mubr.msk.bf16.mxu1 %vm269_vm0, %v251_v15  ;;  %v252_v28 = vpack.c.bf16 %v244_v26, %v243_v25  ;;  %v235_v29 = vld [vmem:[%s1446_s7 + $0x30] sm:$0xff]  ;;  %v236_v30 = vld [vmem:[%s1446_s7 + $0x38] sm:$0xff] }
  0x16   : > { %1293 = vmatprep.subr.bf16.mxu1 %v1292_v16  ;;  %1212 = vmatprep.mubr.msk.bf16.mxu0 %vm269_vm0, %v245_v24  ;;  %v248_v31 = vpack.c.bf16 %v236_v30, %v235_v29 }
  0x17   : > { %1213 = vmatmul.mubr.msk.bf16.vlgmr.msra.gmra.mrb[0].mxu0 %vm269_vm0, %v246_v21 }
  0x18   : > { %1216 = vmatprep.mubr.msk.bf16.mxu0 %vm269_vm0, %v247_v27  ;;  %1299 = vmatpush3.bf16.msra.mxu0 %v1296_v34 }
  0x19   : > { %1295 = vmatpush3.bf16.msra.mxu1 %v1292_v16 }
  0x1c   : > { %1225 = vmatmul.mubr.msk.bf16.gmra.mrb[4].mxu1 %vm269_vm0, %v252_v28 }
  0x1d   : > { %1236 = vmatprep.mubr.msk.f32.mxu1 %vm269_vm0, %v229_v17 }
  0x1f   : > { %1217 = vmatmul.mubr.msk.bf16.gmra.mrb[4].mxu0 %vm269_vm0, %v248_v31 }
  0x24   : > { %1237 = vmatmul.mubr.msk.f32.vlgmr.msra.gmra.mrb[8].mxu1 %vm269_vm0, %v230_v18 }
  0x25   : > { %1239 = vmatprep.mubr.msk.f32.mxu1 %vm269_vm0, %v231_v19 }
  0x28   : > { %1240 = vmatmul.mubr.msk.f32.gmra.mrb[10].mxu1 %vm269_vm0, %v232_v20 }
  0x29   : > { %1242 = vmatprep.mubr.msk.f32.mxu1 %vm269_vm0, %v233_v22 }
  0x2c   : > { %1243 = vmatmul.mubr.msk.f32.gmra.mrb[12].mxu1 %vm269_vm0, %v234_v23 }
  0x2d   : > { %1245 = vmatprep.mubr.msk.f32.mxu1 %vm269_vm0, %v235_v29 }
  0x30   : > { %1246 = vmatmul.mubr.msk.f32.gmra.mrb[14].mxu1 %vm269_vm0, %v236_v30 }
  0x31   : > { %1248 = vmatprep.mubr.msk.f32.mxu1 %vm269_vm0, %v237_v7 }
  0x34   : > { %1249 = vmatmul.mubr.msk.f32.gmra.mrb[16].mxu1 %vm269_vm0, %v238_v8 }
  0x35   : > { %1251 = vmatprep.mubr.msk.f32.mxu1 %vm269_vm0, %v239_v9 }
  0x38   : > { %1252 = vmatmul.mubr.msk.f32.gmra.mrb[18].mxu1 %vm269_vm0, %v240_v11 }
  0x39   : > { %1254 = vmatprep.mubr.msk.f32.mxu1 %vm269_vm0, %v241_v12 }
  0x3c   : > { %1255 = vmatmul.mubr.msk.f32.gmra.mrb[20].mxu1 %vm269_vm0, %v242_v13 }
  0x3d   : > { %1257 = vmatprep.mubr.msk.f32.mxu1 %vm269_vm0, %v243_v25 }
  0x40   : > { %1258 = vmatmul.mubr.msk.f32.gmra.mrb[22].mxu1 %vm269_vm0, %v244_v26 }
  0xe7   : > { %v1222_v35 = vpop.f32.mrb[0].mxu1 }
  0xe8   : > { %402 = vst.msk [vmem:[%s1505_s19 + $0x50] sm:$0xff] %vm391_vm1, %v1222_v35  ;;  %v360_v36 = vpop.f32.mrb[1].mxu1 }
  0xe9   : > { %400 = vst.msk [vmem:[%s1505_s19 + $0x40] sm:$0xff] %vm391_vm1, %v360_v36  ;;  %v1223_v37 = vpop.f32.mrb[2].mxu1 }
  0xea   : > { %403 = vst.msk [vmem:[%s1505_s19 + $0x58] sm:$0xff] %vm391_vm1, %v1223_v37  ;;  %v363_v38 = vpop.f32.mrb[3].mxu1  ;;  %v1214_v39 = vpop.f32.mrb[0].mxu0 }
  0xeb   : > { %401 = vst.msk [vmem:[%s1505_s19 + $0x48] sm:$0xff] %vm391_vm1, %v363_v38  ;;  %394 = vst.msk [vmem:[%s1505_s19 + $0x10] sm:$0xff] %vm391_vm1, %v1214_v39  ;;  %v328_v40 = vpop.f32.mrb[1].mxu0 }
  0xec   : > { %392 = vst.msk [vmem:[%s1505_s19] sm:$0xff] %vm391_vm1, %v328_v40  ;;  %v1215_v41 = vpop.f32.mrb[2].mxu0 }
  0xed   : > { %395 = vst.msk [vmem:[%s1505_s19 + $0x18] sm:$0xff] %vm391_vm1, %v1215_v41  ;;  %v331_v42 = vpop.f32.mrb[3].mxu0 }
  0xee   : > { %393 = vst.msk [vmem:[%s1505_s19 + $0x8] sm:$0xff] %vm391_vm1, %v331_v42 }
  0xef   : > { %v1226_v43 = vpop.f32.mrb[4].mxu1 }
  0xf0   : > { %406 = vst.msk [vmem:[%s1505_s19 + $0x70] sm:$0xff] %vm391_vm1, %v1226_v43  ;;  %v376_v44 = vpop.f32.mrb[5].mxu1 }
  0xf1   : > { %404 = vst.msk [vmem:[%s1505_s19 + $0x60] sm:$0xff] %vm391_vm1, %v376_v44  ;;  %v1227_v45 = vpop.f32.mrb[6].mxu1 }
  0xf2   : > { %407 = vst.msk [vmem:[%s1505_s19 + $0x78] sm:$0xff] %vm391_vm1, %v1227_v45  ;;  %v379_v46 = vpop.f32.mrb[7].mxu1  ;;  %v1218_v47 = vpop.f32.mrb[4].mxu0 }
  0xf3   : > { %405 = vst.msk [vmem:[%s1505_s19 + $0x68] sm:$0xff] %vm391_vm1, %v379_v46  ;;  %398 = vst.msk [vmem:[%s1505_s19 + $0x30] sm:$0xff] %vm391_vm1, %v1218_v47  ;;  %v344_v48 = vpop.f32.mrb[5].mxu0 }
  0xf4   : > { %396 = vst.msk [vmem:[%s1505_s19 + $0x20] sm:$0xff] %vm391_vm1, %v344_v48  ;;  %v1219_v49 = vpop.f32.mrb[6].mxu0 }
  0xf5   : > { %399 = vst.msk [vmem:[%s1505_s19 + $0x38] sm:$0xff] %vm391_vm1, %v1219_v49  ;;  %v347_v50 = vpop.f32.mrb[7].mxu0 }
  0xf6   : > { %397 = vst.msk [vmem:[%s1505_s19 + $0x28] sm:$0xff] %vm391_vm1, %v347_v50 }
  0xf7   : > { %v1238_v51 = vpop.f32.mrb[8].mxu1 }
  0xf8   : > { %v526_v52 = vpop.f32.mrb[9].mxu1 }
  0xf9   : > { %1264 = vmatprep.mubr.msk.f32.mxu0 %vm614_vm2, %v526_v52 }
  0xfa   : > { %1265 = vmatmul.mubr.msk.f32.vlgmr.msra.gmra.mrb[8].mxu0 %vm614_vm2, %v1238_v51 }
  0xfb   : > { %v1241_v53 = vpop.f32.mrb[10].mxu1 }
  0xfc   : > { %v536_v54 = vpop.f32.mrb[11].mxu1 }
  0xfd   : > { %1267 = vmatprep.mubr.msk.f32.mxu0 %vm614_vm2, %v536_v54 }
  0xfe   : > { %1268 = vmatmul.mubr.msk.f32.gmra.mrb[10].mxu0 %vm614_vm2, %v1241_v53 }
  0xff   : > { %v1244_v55 = vpop.f32.mrb[12].mxu1 }
 0x100   : > { %v546_v56 = vpop.f32.mrb[13].mxu1 }
 0x101   : > { %1270 = vmatprep.mubr.msk.f32.mxu0 %vm614_vm2, %v546_v56 }
 0x102   : > { %1271 = vmatmul.mubr.msk.f32.gmra.mrb[12].mxu0 %vm614_vm2, %v1244_v55 }
 0x103   : > { %v1247_v57 = vpop.f32.mrb[14].mxu1 }
 0x104   : > { %v556_v58 = vpop.f32.mrb[15].mxu1 }
 0x105   : > { %1273 = vmatprep.mubr.msk.f32.mxu0 %vm614_vm2, %v556_v58 }
 0x106   : > { %1274 = vmatmul.mubr.msk.f32.gmra.mrb[14].mxu0 %vm614_vm2, %v1247_v57 }
 0x107   : > { %v1250_v59 = vpop.f32.mrb[16].mxu1 }
 0x108   : > { %v566_v60 = vpop.f32.mrb[17].mxu1 }
 0x109   : > { %1276 = vmatprep.mubr.msk.f32.mxu0 %vm614_vm2, %v566_v60 }
 0x10a   : > { %1277 = vmatmul.mubr.msk.f32.gmra.mrb[16].mxu0 %vm614_vm2, %v1250_v59 }
 0x10b   : > { %v1253_v61 = vpop.f32.mrb[18].mxu1 }
 0x10c   : > { %v576_v62 = vpop.f32.mrb[19].mxu1 }
 0x10d   : > { %1279 = vmatprep.mubr.msk.f32.mxu0 %vm614_vm2, %v576_v62 }
 0x10e   : > { %1280 = vmatmul.mubr.msk.f32.gmra.mrb[18].mxu0 %vm614_vm2, %v1253_v61 }
 0x10f   : > { %v1256_v63 = vpop.f32.mrb[20].mxu1 }
 0x110   : > { %v586_v0 = vpop.f32.mrb[21].mxu1 }
 0x111   : > { %1282 = vmatprep.mubr.msk.f32.mxu0 %vm614_vm2, %v586_v0 }
 0x112   : > { %1283 = vmatmul.mubr.msk.f32.gmra.mrb[20].mxu0 %vm614_vm2, %v1256_v63 }
 0x113   : > { %v1259_v1 = vpop.f32.mrb[22].mxu1 }
 0x114   : > { %v596_v2 = vpop.f32.mrb[23].mxu1 }
 0x115   : > { %1285 = vmatprep.mubr.msk.f32.mxu0 %vm614_vm2, %v596_v2 }
 0x116   : > { %1286 = vmatmul.mubr.msk.f32.gmra.mrb[22].mxu0 %vm614_vm2, %v1259_v1 }
 0x1cd   : > { %v1266_v4 = vpop.f32.mrb[8].mxu0 }
 0x1ce   : > { %v729_v5 = vpop.f32.mrb[9].mxu0  ;;  %v1569_v13 = vadd.f32 %v1266_v4, %v1558_v3 }
 0x1cf   : > { %v1561_v6 = vadd.f32 %v1558_v3, %v729_v5 }
 0x1d0   : > { %v825_v23 = vand.u32 2147483647, %v1569_v13 }
 0x1d1   : > { %v1269_v7 = vpop.f32.mrb[10].mxu0  ;;  %v824_v8 = vand.u32 2147483647, %v1561_v6 }
 0x1d2   : > { %v739_v9 = vpop.f32.mrb[11].mxu0  ;;  %v1575_v17 = vadd.f32 %v1269_v7, %v1558_v3  ;;  %v841_v33 = vsub.f32 0.0, %v825_v23 }
 0x1d3   : > { %v1565_v10 = vadd.f32 %v1558_v3, %v739_v9  ;;  %v840_v14 = vsub.f32 0.0, %v824_v8 }
 0x1d4   : > { %v827_v27 = vand.u32 2147483647, %v1575_v17  ;;  %v858_v42 = vmul.f32 1.442695, %v841_v33 }
 0x1d5   : > { %v826_v11 = vand.u32 2147483647, %v1565_v10  ;;  %v1272_v12 = vpop.f32.mrb[12].mxu0  ;;  %v856_v24 = vmul.f32 1.442695, %v840_v14 }
 0x1d6   : > { %v1572_v15 = vadd.f32 %v1272_v12, %v1558_v3  ;;  %v749_v16 = vpop.f32.mrb[13].mxu0  ;;  %v843_v37 = vsub.f32 0.0, %v827_v27 }
 0x1d7   : > { %v842_v18 = vsub.f32 0.0, %v826_v11  ;;  %v1578_v19 = vadd.f32 %v1558_v3, %v749_v16  ;;  %1315 = vpow2.f32 %v856_v24 }
 0x1d8   : > { %v829_v20 = vand.u32 2147483647, %v1572_v15  ;;  %v862_v46 = vmul.f32 1.442695, %v843_v37 }
 0x1d9   : > { %v828_v21 = vand.u32 2147483647, %v1578_v19  ;;  %v1275_v22 = vpop.f32.mrb[14].mxu0  ;;  %v860_v28 = vmul.f32 1.442695, %v842_v18 }
 0x1da   : > { %v845_v25 = vsub.f32 0.0, %v829_v20  ;;  %v759_v26 = vpop.f32.mrb[15].mxu0  ;;  %v1588_v31 = vadd.f32 %v1275_v22, %v1558_v3 }
 0x1db   : > { %v844_v29 = vsub.f32 0.0, %v828_v21  ;;  %v1585_v30 = vadd.f32 %v1558_v3, %v759_v26  ;;  %1317 = vpow2.f32 %v860_v28 }
 0x1dc   : > { %v866_v34 = vmul.f32 1.442695, %v845_v25  ;;  %v831_v40 = vand.u32 2147483647, %v1588_v31 }
 0x1dd   : > { %v1278_v32 = vpop.f32.mrb[16].mxu0  ;;  %v830_v35 = vand.u32 2147483647, %v1585_v30  ;;  %v864_v38 = vmul.f32 1.442695, %v844_v29 }
 0x1de   : > { %v769_v36 = vpop.f32.mrb[17].mxu0  ;;  %v1596_v41 = vadd.f32 %v1278_v32, %v1558_v3  ;;  %1319 = vpow2.f32 %v866_v34  ;;  %v847_v48 = vsub.f32 0.0, %v831_v40 }
 0x1df   : > { %v1592_v39 = vadd.f32 %v1558_v3, %v769_v36  ;;  %v846_v43 = vsub.f32 0.0, %v830_v35  ;;  %1321 = vpow2.f32 %v864_v38 }
 0x1e0   : > { %v833_v49 = vand.u32 2147483647, %v1596_v41  ;;  %1323 = vpow2.f32 %v858_v42  ;;  %v870_v58 = vmul.f32 1.442695, %v847_v48 }
 0x1e1   : > { %v832_v44 = vand.u32 2147483647, %v1592_v39  ;;  %v1281_v45 = vpop.f32.mrb[18].mxu0  ;;  %v868_v52 = vmul.f32 1.442695, %v846_v43  ;;  %1325 = vpow2.f32 %v862_v46  ;;  %v1316_v57 = vpop.eup %1315 }
 0x1e2   : > { %v779_v47 = vpop.f32.mrb[19].mxu0  ;;  %v1604_v51 = vadd.f32 %v1281_v45, %v1558_v3  ;;  %v849_v59 = vsub.f32 0.0, %v833_v49  ;;  %v888_v4 = vadd.f32 1.0, %v1316_v57 }
 0x1e3   : > { %v1601_v50 = vadd.f32 %v1558_v3, %v779_v47  ;;  %v848_v53 = vsub.f32 0.0, %v832_v44  ;;  %1327 = vpow2.f32 %v868_v52 }
 0x1e4   : > { %v835_v62 = vand.u32 2147483647, %v1604_v51  ;;  %1329 = vpow2.f32 %v870_v58  ;;  %v874_v9 = vmul.f32 1.442695, %v849_v59 }
 0x1e5   : > { %v834_v54 = vand.u32 2147483647, %v1601_v50  ;;  %v1284_v55 = vpop.f32.mrb[20].mxu0  ;;  %v1318_v61 = vpop.eup %1317  ;;  %v872_v0 = vmul.f32 1.442695, %v848_v53 }
 0x1e6   : > { %v789_v56 = vpop.f32.mrb[21].mxu0  ;;  %v1612_v63 = vadd.f32 %v1284_v55, %v1558_v3  ;;  %v890_v8 = vadd.f32 1.0, %v1318_v61  ;;  %v851_v14 = vsub.f32 0.0, %v835_v62  ;;  %v809_v62 = vmin.f32 %v1569_v13, 0.0 }
 0x1e7   : > { %v1608_v60 = vadd.f32 %v1558_v3, %v789_v56  ;;  %v850_v1 = vsub.f32 0.0, %v834_v54  ;;  %1331 = vpow2.f32 %v872_v0  ;;  %v808_v0 = vmin.f32 %v1561_v6, 0.0 }
 0x1e8   : > { %v1320_v7 = vpop.eup %1319  ;;  %v837_v16 = vand.u32 2147483647, %v1612_v63  ;;  %1333 = vlog2.f32 %v888_v4  ;;  %v878_v28 = vmul.f32 1.442695, %v851_v14  ;;  %v812_v6 = vmin.f32 %v1578_v19, 0.0 }
 0x1e9   : > { %v836_v2 = vand.u32 2147483647, %v1608_v60  ;;  %v1287_v5 = vpop.f32.mrb[22].mxu0  ;;  %v1322_v12 = vpop.eup %1321  ;;  %v876_v21 = vmul.f32 1.442695, %v850_v1  ;;  %v893_v23 = vadd.f32 1.0, %v1320_v7  ;;  %1335 = vpow2.f32 %v874_v9 }
 0x1ea   : > { %v799_v11 = vpop.f32.mrb[23].mxu0  ;;  %v1617_v18 = vadd.f32 %v1287_v5, %v1558_v3  ;;  %v1324_v25 = vpop.eup %1323  ;;  %v892_v26 = vadd.f32 1.0, %v1322_v12  ;;  %1337 = vlog2.f32 %v890_v8  ;;  %v853_v29 = vsub.f32 0.0, %v837_v16 }
 0x1eb   : > { %v1620_v20 = vadd.f32 %v1558_v3, %v799_v11  ;;  %v852_v22 = vsub.f32 0.0, %v836_v2  ;;  %v1326_v27 = vpop.eup %1325  ;;  %1339 = vpow2.f32 %v876_v21  ;;  %v889_v34 = vadd.f32 1.0, %v1324_v25 }
 0x1ec   : > { %v839_v32 = vand.u32 2147483647, %v1617_v18  ;;  %1341 = vlog2.f32 %v893_v23  ;;  %v891_v36 = vadd.f32 1.0, %v1326_v27  ;;  %v882_v37 = vmul.f32 1.442695, %v853_v29 }
 0x1ed   : > { %v838_v24 = vand.u32 2147483647, %v1620_v20  ;;  %v880_v33 = vmul.f32 1.442695, %v852_v22  ;;  %v1328_v35 = vpop.eup %1327  ;;  %1343 = vlog2.f32 %v892_v26  ;;  %v811_v9 = vmin.f32 %v1575_v17, 0.0 }
 0x1ee   : > { %1345 = vpow2.f32 %v878_v28  ;;  %v855_v38 = vsub.f32 0.0, %v839_v32  ;;  %v1330_v40 = vpop.eup %1329  ;;  %v894_v43 = vadd.f32 1.0, %v1328_v35  ;;  %v810_v16 = vmin.f32 %v1565_v10, 0.0 }
 0x1ef   : > { %v854_v3 = vsub.f32 0.0, %v838_v24  ;;  %1347 = vpow2.f32 %v880_v33  ;;  %v895_v48 = vadd.f32 1.0, %v1330_v40  ;;  %v813_v19 = vmin.f32 %v1572_v15, 0.0 }
 0x1f0   : > { %1349 = vlog2.f32 %v889_v34  ;;  %v886_v46 = vmul.f32 1.442695, %v855_v38  ;;  %v814_v35 = vmin.f32 %v1585_v30, 0.0  ;;  %v815_v15 = vmin.f32 %v1588_v31, 0.0 }
 0x1f1   : > { %v884_v42 = vmul.f32 1.442695, %v854_v3  ;;  %v1332_v44 = vpop.eup %1331  ;;  %1351 = vlog2.f32 %v891_v36  ;;  %v816_v30 = vmin.f32 %v1592_v39, 0.0  ;;  %v818_v31 = vmin.f32 %v1601_v50, 0.0 }
 0x1f2   : > { %v1334_v45 = vpop.eup %1333  ;;  %1353 = vpow2.f32 %v882_v37  ;;  %v896_v52 = vadd.f32 1.0, %v1332_v44 }
 0x1f3   : > { %v1336_v47 = vpop.eup %1335  ;;  %1355 = vpow2.f32 %v884_v42  ;;  %v905_v1 = vmul.f32 0.6931472, %v1334_v45 }
 0x1f4   : > { %v1338_v49 = vpop.eup %1337  ;;  %1357 = vlog2.f32 %v894_v43  ;;  %v897_v56 = vadd.f32 1.0, %v1336_v47 }
 0x1f5   : > { %v1340_v53 = vpop.eup %1339  ;;  %1359 = vpow2.f32 %v886_v46  ;;  %v909_v7 = vmul.f32 0.6931472, %v1338_v49  ;;  %v936_v24 = vsub.f32 %v808_v0, %v905_v1 }
 0x1f6   : > { %v1342_v54 = vpop.eup %1341  ;;  %1361 = vlog2.f32 %v895_v48  ;;  %v898_v58 = vadd.f32 1.0, %v1340_v53 }
 0x1f7   : > { %v1344_v55 = vpop.eup %1343  ;;  %1363 = vlog2.f32 %v896_v52  ;;  %v938_v27 = vsub.f32 %v810_v16, %v909_v7  ;;  %v915_v32 = vmul.f32 0.6931472, %v1342_v54  ;;  %v953_v37 = vmul.f32 0.0625, %v936_v24 }
 0x1f8   : > { %v1346_v57 = vpop.eup %1345  ;;  %1365 = vlog2.f32 %v897_v56  ;;  %v913_v22 = vmul.f32 0.6931472, %v1344_v55  ;;  %v821_v16 = vmin.f32 %v1612_v63, 0.0 }
 0x1f9   : > { %v1348_v59 = vpop.eup %1347  ;;  %v899_v4 = vadd.f32 1.0, %v1346_v57  ;;  %1367 = vlog2.f32 %v898_v58  ;;  %v955_v38 = vmul.f32 0.0625, %v938_v27  ;;  %v941_v40 = vsub.f32 %v813_v19, %v915_v32 }
 0x1fa   : > { %v1350_v61 = vpop.eup %1349  ;;  %v900_v11 = vadd.f32 1.0, %v1348_v59  ;;  %v940_v10 = vsub.f32 %v812_v6, %v913_v22  ;;  %v817_v58 = vmin.f32 %v1596_v41, 0.0  ;;  %v820_v41 = vmin.f32 %v1608_v60, 0.0 }
 0x1fb   : > { %v1352_v2 = vpop.eup %1351  ;;  %v907_v5 = vmul.f32 0.6931472, %v1350_v61  ;;  %1369 = vlog2.f32 %v899_v4  ;;  %v958_v48 = vmul.f32 0.0625, %v941_v40 }
 0x1fc   : > { %v1354_v8 = vpop.eup %1353  ;;  %v911_v12 = vmul.f32 0.6931472, %v1352_v2  ;;  %1371 = vlog2.f32 %v900_v11  ;;  %v957_v44 = vmul.f32 0.0625, %v940_v10 }
 0x1fd   : > { %v1356_v14 = vpop.eup %1355  ;;  %v937_v21 = vsub.f32 %v809_v62, %v907_v5  ;;  %v901_v25 = vadd.f32 1.0, %v1354_v8  ;;  %v819_v5 = vmin.f32 %v1604_v51, 0.0 }
 0x1fe   : > { %v1358_v13 = vpop.eup %1357  ;;  %v939_v23 = vsub.f32 %v811_v9, %v911_v12  ;;  %v902_v17 = vadd.f32 1.0, %v1356_v14 }
 0x1ff   : > { %v954_v26 = vmul.f32 0.0625, %v937_v21  ;;  %v1360_v28 = vpop.eup %1359  ;;  %v917_v3 = vmul.f32 0.6931472, %v1358_v13  ;;  %1373 = vlog2.f32 %v901_v25  ;;  %v822_v21 = vmin.f32 %v1620_v20, 0.0 }
 0x200   : > { %v956_v29 = vmul.f32 0.0625, %v939_v23  ;;  %v1362_v33 = vpop.eup %1361  ;;  %v903_v36 = vadd.f32 1.0, %v1360_v28  ;;  %1375 = vlog2.f32 %v902_v17  ;;  %v823_v23 = vmin.f32 %v1617_v18, 0.0 }
 0x201   : > { %987 = vrot.lane.b32.xlu0 %v954_v26, %s1387_s22  ;;  %v1364_v34 = vpop.eup %1363  ;;  %v919_v42 = vmul.f32 0.6931472, %v1362_v33  ;;  %v942_v45 = vsub.f32 %v814_v35, %v917_v3 }
 0x202   : > { %991 = vrot.lane.b32.xlu1 %v956_v29, %s1387_s22  ;;  %v1366_v43 = vpop.eup %1365  ;;  %v921_v46 = vmul.f32 0.6931472, %v1364_v34  ;;  %1377 = vlog2.f32 %v903_v36 }
 0x203   : > { %v1368_v47 = vpop.eup %1367  ;;  %v943_v49 = vsub.f32 %v815_v15, %v919_v42  ;;  %v923_v52 = vmul.f32 0.6931472, %v1366_v43  ;;  %v959_v54 = vmul.f32 0.0625, %v942_v45 }
 0x204   : > { %v944_v55 = vsub.f32 %v816_v30, %v921_v46  ;;  %v925_v56 = vmul.f32 0.6931472, %v1368_v47 }
 0x205   : > { %985 = vrot.lane.b32.xlu0 %v953_v37, %s1387_s22  ;;  %v1370_v53 = vpop.eup %1369  ;;  %v960_v59 = vmul.f32 0.0625, %v943_v49  ;;  %v945_v61 = vsub.f32 %v817_v58, %v923_v52 }
 0x206   : > { %989 = vrot.lane.b32.xlu1 %v955_v38, %s1387_s22  ;;  %v1372_v57 = vpop.eup %1371  ;;  %v927_v39 = vmul.f32 0.6931472, %v1370_v53  ;;  %v961_v0 = vmul.f32 0.0625, %v944_v55  ;;  %v946_v1 = vsub.f32 %v818_v31, %v925_v56 }
 0x207   : > { %v929_v2 = vmul.f32 0.6931472, %v1372_v57  ;;  %v962_v7 = vmul.f32 0.0625, %v945_v61 }
 0x208   : > { %v947_v8 = vsub.f32 %v819_v5, %v927_v39  ;;  %v963_v11 = vmul.f32 0.0625, %v946_v1 }
 0x209   : > { %993 = vrot.lane.b32.xlu0 %v957_v44, %s1387_s22  ;;  %v1374_v62 = vpop.eup %1373  ;;  %v948_v12 = vsub.f32 %v820_v41, %v929_v2 }
 0x20a   : > { %995 = vrot.lane.b32.xlu1 %v958_v48, %s1387_s22  ;;  %v1376_v4 = vpop.eup %1375  ;;  %v931_v9 = vmul.f32 0.6931472, %v1374_v62  ;;  %v964_v51 = vmul.f32 0.0625, %v947_v8 }
 0x20b   : > { %v933_v14 = vmul.f32 0.6931472, %v1376_v4  ;;  %v965_v60 = vmul.f32 0.0625, %v948_v12 }
 0x20c   : > { %v1378_v50 = vpop.eup %1377  ;;  %v949_v22 = vsub.f32 %v821_v16, %v931_v9 }
 0x20d   : > { %997 = vrot.lane.b32.xlu0 %v959_v54, %s1387_s22  ;;  %v935_v13 = vmul.f32 0.6931472, %v1378_v50  ;;  %v950_v6 = vsub.f32 %v822_v21, %v933_v14 }
 0x20e   : > { %999 = vrot.lane.b32.xlu1 %v960_v59, %s1387_s22  ;;  %v966_v24 = vmul.f32 0.0625, %v949_v22 }
 0x20f   : > { %v951_v63 = vsub.f32 %v823_v23, %v935_v13  ;;  %v967_v20 = vmul.f32 0.0625, %v950_v6 }
 0x211   : > { %1001 = vrot.lane.b32.xlu0 %v961_v0, %s1387_s22  ;;  %v968_v25 = vmul.f32 0.0625, %v951_v63 }
 0x212   : > { %1003 = vrot.lane.b32.xlu1 %v962_v7, %s1387_s22 }
 0x215   : > { %1005 = vrot.lane.b32.xlu0 %v963_v11, %s1387_s22 }
 0x216   : > { %1007 = vrot.lane.b32.xlu1 %v964_v51, %s1387_s22 }
 0x219   : > { %1009 = vrot.lane.b32.xlu0 %v965_v60, %s1387_s22 }
 0x21a   : > { %1011 = vrot.lane.b32.xlu1 %v966_v24, %s1387_s22 }
 0x21d   : > { %1013 = vrot.lane.b32.xlu0 %v967_v20, %s1387_s22 }
 0x21e   : > { %1015 = vrot.lane.b32.xlu1 %v968_v25, %s1387_s22 }
 0x273   : > { %v988_v18 = vpop.permute.xlu0 %987 }
 0x274   : > { %1035 = vst.msk [vmem:[%s1505_s19 + $0x8] sm:$0xff] %vm1033_vm3, %v988_v18  ;;  %v992_v26 = vpop.permute.xlu1 %991 }
 0x275   : > { %1037 = vst.msk [vmem:[%s1505_s19 + $0x18] sm:$0xff] %vm1033_vm3, %v992_v26 }
 0x277   : > { %v986_v27 = vpop.permute.xlu0 %985 }
 0x278   : > { %1034 = vst.msk [vmem:[%s1505_s19] sm:$0xff] %vm1033_vm3, %v986_v27  ;;  %v990_v28 = vpop.permute.xlu1 %989 }
 0x279   : > { %1036 = vst.msk [vmem:[%s1505_s19 + $0x10] sm:$0xff] %vm1033_vm3, %v990_v28 }
 0x27b   : > { %v994_v17 = vpop.permute.xlu0 %993 }
 0x27c   : > { %1038 = vst.msk [vmem:[%s1505_s19 + $0x20] sm:$0xff] %vm1033_vm3, %v994_v17  ;;  %v996_v29 = vpop.permute.xlu1 %995 }
 0x27d   : > { %1039 = vst.msk [vmem:[%s1505_s19 + $0x28] sm:$0xff] %vm1033_vm3, %v996_v29 }
 0x27f   : > { %v998_v32 = vpop.permute.xlu0 %997 }
 0x280   : > { %1040 = vst.msk [vmem:[%s1505_s19 + $0x30] sm:$0xff] %vm1033_vm3, %v998_v32  ;;  %v1000_v33 = vpop.permute.xlu1 %999 }
 0x281   : > { %1041 = vst.msk [vmem:[%s1505_s19 + $0x38] sm:$0xff] %vm1033_vm3, %v1000_v33 }
 0x283   : > { %v1002_v10 = vpop.permute.xlu0 %1001 }
 0x284   : > { %1042 = vst.msk [vmem:[%s1505_s19 + $0x40] sm:$0xff] %vm1033_vm3, %v1002_v10  ;;  %v1004_v3 = vpop.permute.xlu1 %1003 }
 0x285   : > { %1043 = vst.msk [vmem:[%s1505_s19 + $0x48] sm:$0xff] %vm1033_vm3, %v1004_v3 }
 0x287   : > { %v1006_v34 = vpop.permute.xlu0 %1005 }
 0x288   : > { %1044 = vst.msk [vmem:[%s1505_s19 + $0x50] sm:$0xff] %vm1033_vm3, %v1006_v34  ;;  %v1008_v19 = vpop.permute.xlu1 %1007 }
 0x289   : > { %1045 = vst.msk [vmem:[%s1505_s19 + $0x58] sm:$0xff] %vm1033_vm3, %v1008_v19 }
 0x28b   : > { %v1010_v35 = vpop.permute.xlu0 %1009 }
 0x28c   : > { %1046 = vst.msk [vmem:[%s1505_s19 + $0x60] sm:$0xff] %vm1033_vm3, %v1010_v35  ;;  %v1012_v36 = vpop.permute.xlu1 %1011 }
 0x28d   : > { %1047 = vst.msk [vmem:[%s1505_s19 + $0x68] sm:$0xff] %vm1033_vm3, %v1012_v36 }
 0x28f   : > { %v1014_v37 = vpop.permute.xlu0 %1013 }
 0x290   : > { %1048 = vst.msk [vmem:[%s1505_s19 + $0x70] sm:$0xff] %vm1033_vm3, %v1014_v37  ;;  %v1016_v38 = vpop.permute.xlu1 %1015 }
 0x291   : > { %1049 = vst.msk [vmem:[%s1505_s19 + $0x78] sm:$0xff] %vm1033_vm3, %v1016_v38 }
 0x292 PF: > { %s15_s18 = sadd.s32 1, %s1385_s18  }
 0x293   : > { %p12_p4 = scmp.ge.s32.totalorder %s15_s18, 4  }
 0x295   :  { %14 = sbr.rel (!%p12_p4) target bundleno = 1 (0x1), region = 70 }

</bundles_post_ra>
